<compile_context>
chip_gen: v7x
topology: tpu7x:2x2x1
jax: 0.10.0
libtpu: 0.0.40
codegen_flags: <defaults>
</compile_context>

<pallas_src>
import math
import numpy as np
import jax
import jax.numpy as jnp
from jax.experimental import pallas as pl
from jax.experimental.pallas import tpu as pltpu

LANE = 128          # vreg lane width
SUBLANE = 8         # f32 sublane width
MAX_ROW_TILE = 512  # rows per grid step (v7x-safe; 85%+ HBM roofline per docs)

# ----------------------------- model dims ------------------------------------
B = 2          # batch
L = 32         # sequence length
D_IN = 32      # FeedForward d_in
D_OUT = 32     # FeedForward d_out
MULT = 4       # hidden = d_in * mult = 128


def _round_up(x, m):
    return (x + m - 1) // m * m


# ------------------------------- kernel ---------------------------------------
def ff_kernel(x_ref, w1_ref, b1_ref, w2_ref, b2_ref, o_ref):
    # proj_in: bf16 operands on the MXU, f32 accumulation.
    h = jnp.dot(x_ref[...], w1_ref[...], preferred_element_type=jnp.float32)
    h = h + b1_ref[...]
    # TODO(synk): PyTorch nn.GELU defaults to the exact erf formulation; erf has
    # no guaranteed Pallas/Mosaic lowering, so the tanh approximation is used.
    h = jax.nn.gelu(h, approximate=True)
    # proj_out: cast activation to bf16 only AFTER the f32 GELU (v5e has no
    # bf16 VPU/EUP); output width is pre-padded to 128 lanes -> unmasked vst.
    o_ref[...] = (jnp.dot(h.astype(jnp.bfloat16), w2_ref[...],
                          preferred_element_type=jnp.float32)
                  + b2_ref[...])


# --------------------------- one-time param prep --------------------------------
def prepare_params(params):
    """Hoisted out of the forward path: cast weights to bf16 and zero-pad the
    contraction (d_in) and output (d_out) dims to 128-lane multiples."""
    w1, b1, w2, b2 = params["w1"], params["b1"], params["w2"], params["b2"]
    d_in, hidden = w1.shape
    d_out = w2.shape[1]
    d_in_pad = _round_up(d_in, LANE)
    d_out_pad = _round_up(d_out, LANE)

    w1p = w1.astype(jnp.bfloat16)
    if d_in_pad != d_in:
        w1p = jnp.zeros((d_in_pad, hidden), jnp.bfloat16).at[:d_in, :].set(w1p)

    w2p = w2.astype(jnp.bfloat16)
    b2p = b2.astype(jnp.float32)
    if d_out_pad != d_out:  # skip pad + post-call slice when already 128-aligned
        w2p = jnp.zeros((hidden, d_out_pad), jnp.bfloat16).at[:, :d_out].set(w2p)
        b2p = jnp.zeros((1, d_out_pad), jnp.float32).at[:, :d_out].set(b2p)

    return dict(w1=w1p, b1=b1.astype(jnp.float32), w2=w2p, b2=b2p,
                d_in=d_in, d_in_pad=d_in_pad, hidden=hidden,
                d_out=d_out, d_out_pad=d_out_pad)


# ------------------------------- wrapper ---------------------------------------
def feed_forward(x, prep):
    """x: (B, L, d_in) float32 -> (B, L, d_out) float32."""
    d_in, d_in_pad = prep["d_in"], prep["d_in_pad"]
    hidden = prep["hidden"]
    d_out, d_out_pad = prep["d_out"], prep["d_out_pad"]
    batch, seq, _ = x.shape
    rows = batch * seq

    # Row tiling: one "parallel" grid axis so v7x can shard across its 2 TCs;
    # tile capped at 512 rows to fit v7x VMEM, big enough for v5e/v6e roofline.
    tm = min(MAX_ROW_TILE, _round_up(rows, SUBLANE))
    rows_pad = _round_up(rows, tm)
    grid_rows = rows_pad // tm

    # Per-call activation prep: fold (B, L) into rows, cast to bf16, zero-pad
    # rows / contraction lanes as needed (exact: zeros contribute nothing).
    x2d = x.reshape(rows, d_in).astype(jnp.bfloat16)
    if (rows_pad != rows) or (d_in_pad != d_in):
        x2d = jnp.zeros((rows_pad, d_in_pad), jnp.bfloat16).at[:rows, :d_in].set(x2d)

    cost = pl.CostEstimate(
        flops=2 * rows_pad * (d_in_pad * hidden + hidden * d_out_pad),
        transcendentals=rows_pad * hidden,
        bytes_accessed=(x2d.size * 2
                        + prep["w1"].size * 2 + prep["b1"].size * 4
                        + prep["w2"].size * 2 + prep["b2"].size * 4
                        + rows_pad * d_out_pad * 4),
    )

    out = pl.pallas_call(
        ff_kernel,
        out_shape=jax.ShapeDtypeStruct((rows_pad, d_out_pad), jnp.float32),
        grid=(grid_rows,),
        in_specs=[
            pl.BlockSpec((tm, d_in_pad), lambda i: (i, 0)),
            pl.BlockSpec((d_in_pad, hidden), lambda i: (0, 0)),   # resident
            pl.BlockSpec((1, hidden), lambda i: (0, 0)),          # resident
            pl.BlockSpec((hidden, d_out_pad), lambda i: (0, 0)),  # resident
            pl.BlockSpec((1, d_out_pad), lambda i: (0, 0)),       # resident
        ],
        out_specs=pl.BlockSpec((tm, d_out_pad), lambda i: (i, 0)),
        compiler_params=pltpu.CompilerParams(
            dimension_semantics=("parallel",)),
        cost_estimate=cost,
    )(x2d, prep["w1"], prep["b1"], prep["w2"], prep["b2"])

    if (rows_pad != rows) or (d_out_pad != d_out):
        out = out[:rows, :d_out]
    return out.reshape(batch, seq, d_out)


# ------------------------- params / reference ----------------------------------
def init_params(key):
    """PyTorch nn.Linear default init: U(-1/sqrt(fan_in), 1/sqrt(fan_in))."""
    hidden = D_IN * MULT
    k1, k2, k3, k4 = jax.random.split(key, 4)
    lim1 = 1.0 / math.sqrt(D_IN)
    lim2 = 1.0 / math.sqrt(hidden)
    w1 = jax.random.uniform(k1, (D_IN, hidden), jnp.float32, -lim1, lim1)
    b1 = jax.random.uniform(k2, (1, hidden), jnp.float32, -lim1, lim1)
    w2 = jax.random.uniform(k3, (hidden, D_OUT), jnp.float32, -lim2, lim2)
    b2 = jax.random.uniform(k4, (1, D_OUT), jnp.float32, -lim2, lim2)
    return dict(w1=w1, b1=b1, w2=w2, b2=b2)


def reference_forward(x, params):
    h = x @ params["w1"] + params["b1"]
    h = jax.nn.gelu(h, approximate=True)
    return h @ params["w2"] + params["b2"]


# --------------------------------- main -----------------------------------------
if __name__ == "__main__":
    key = jax.random.PRNGKey(0)
    pkey, xkey = jax.random.split(key)
    params = init_params(pkey)
    prep = jax.block_until_ready(prepare_params(params))   # one-time, off the fwd path
    x = jax.random.normal(xkey, (B, L, D_IN), jnp.float32)

    out = jax.block_until_ready(feed_forward(x, prep))
    ref = jax.block_until_ready(reference_forward(x, params))

    assert out.shape == (B, L, D_OUT)
    assert np.all(np.isfinite(np.asarray(out)))
    np.testing.assert_allclose(np.asarray(out), np.asarray(ref), rtol=3e-2, atol=3e-2)

    print("KERNEL_OK")
</pallas_src>

<mosaic_0001>
module attributes {stable_mosaic.version = 11 : i64} {
  func.func @ff_kernel(%arg0: i32, %arg1: memref<64x128xbf16, #tpu.memory_space<vmem>>, %arg2: memref<128x128xbf16, #tpu.memory_space<vmem>>, %arg3: memref<1x128xf32, #tpu.memory_space<vmem>>, %arg4: memref<128x128xbf16, #tpu.memory_space<vmem>>, %arg5: memref<1x128xf32, #tpu.memory_space<vmem>>, %arg6: memref<64x128xf32, #tpu.memory_space<vmem>>) attributes {dimension_semantics = [#tpu.dimension_semantics<parallel>], iteration_bounds = array<i64: 1>, scalar_prefetch = 0 : i64, scratch_operands = 0 : i64, tpu.core_type = #tpu.core_type<tc>, window_params = [{transform_indices = @transform_0, window_bounds = array<i64: 64, 128>}, {pipeline_mode = #tpu.pipeline_mode<synchronous>, transform_indices = @transform_1, window_bounds = array<i64: 128, 128>}, {pipeline_mode = #tpu.pipeline_mode<synchronous>, transform_indices = @transform_2, window_bounds = array<i64: 1, 128>}, {pipeline_mode = #tpu.pipeline_mode<synchronous>, transform_indices = @transform_3, window_bounds = array<i64: 128, 128>}, {pipeline_mode = #tpu.pipeline_mode<synchronous>, transform_indices = @transform_4, window_bounds = array<i64: 1, 128>}, {transform_indices = @transform_5, window_bounds = array<i64: 64, 128>}]} {
    %c0 = arith.constant 0 : index
    %c0_0 = arith.constant 0 : index
    %0 = vector.load %arg1[%c0, %c0_0] : memref<64x128xbf16, #tpu.memory_space<vmem>>, vector<64x128xbf16>
    %c0_1 = arith.constant 0 : index
    %c0_2 = arith.constant 0 : index
    %1 = vector.load %arg2[%c0_1, %c0_2] : memref<128x128xbf16, #tpu.memory_space<vmem>>, vector<128x128xbf16>
    %cst = arith.constant dense<0.000000e+00> : vector<64x128xf32>
    %2 = tpu.matmul %0, %1, %cst {dimension_numbers = #tpu.dot_dimension_numbers<[1], [0], [0], [1], [0, 0, 1, 1], [], []>} : vector<64x128xbf16>, vector<128x128xbf16>, vector<64x128xf32> -> vector<64x128xf32>
    %c0_3 = arith.constant 0 : index
    %c0_4 = arith.constant 0 : index
    %3 = vector.load %arg3[%c0_3, %c0_4] : memref<1x128xf32, #tpu.memory_space<vmem>>, vector<1x128xf32>
    %4 = vector.broadcast %3 : vector<1x128xf32> to vector<64x128xf32>
    %5 = arith.addf %2, %4 : vector<64x128xf32>
    %6 = arith.mulf %5, %5 : vector<64x128xf32>
    %7 = arith.mulf %5, %6 : vector<64x128xf32>
    %cst_5 = arith.constant 4.471500e-02 : f32
    %8 = vector.broadcast %cst_5 : f32 to vector<64x128xf32>
    %9 = arith.mulf %8, %7 : vector<64x128xf32>
    %10 = arith.addf %5, %9 : vector<64x128xf32>
    %cst_6 = arith.constant 0.797884583 : f32
    %11 = vector.broadcast %cst_6 : f32 to vector<64x128xf32>
    %12 = arith.mulf %11, %10 : vector<64x128xf32>
    %13 = math.tanh %12 : vector<64x128xf32>
    %cst_7 = arith.constant 1.000000e+00 : f32
    %14 = vector.broadcast %cst_7 : f32 to vector<64x128xf32>
    %15 = arith.addf %14, %13 : vector<64x128xf32>
    %cst_8 = arith.constant 5.000000e-01 : f32
    %16 = vector.broadcast %cst_8 : f32 to vector<64x128xf32>
    %17 = arith.mulf %16, %15 : vector<64x128xf32>
    %18 = arith.mulf %5, %17 : vector<64x128xf32>
    %19 = arith.truncf %18 : vector<64x128xf32> to vector<64x128xbf16>
    %c0_9 = arith.constant 0 : index
    %c0_10 = arith.constant 0 : index
    %20 = vector.load %arg4[%c0_9, %c0_10] : memref<128x128xbf16, #tpu.memory_space<vmem>>, vector<128x128xbf16>
    %cst_11 = arith.constant dense<0.000000e+00> : vector<64x128xf32>
    %21 = tpu.matmul %19, %20, %cst_11 {dimension_numbers = #tpu.dot_dimension_numbers<[1], [0], [0], [1], [0, 0, 1, 1], [], []>} : vector<64x128xbf16>, vector<128x128xbf16>, vector<64x128xf32> -> vector<64x128xf32>
    %c0_12 = arith.constant 0 : index
    %c0_13 = arith.constant 0 : index
    %22 = vector.load %arg5[%c0_12, %c0_13] : memref<1x128xf32, #tpu.memory_space<vmem>>, vector<1x128xf32>
    %23 = vector.broadcast %22 : vector<1x128xf32> to vector<64x128xf32>
    %24 = arith.addf %21, %23 : vector<64x128xf32>
    %c0_14 = arith.constant 0 : index
    %c0_15 = arith.constant 0 : index
    %25 = vector.load %arg6[%c0_14, %c0_15] : memref<64x128xf32, #tpu.memory_space<vmem>>, vector<64x128xf32>
    tpu.vector_store %arg6[%c0_14, %c0_15], %24 {strides = array<i32>} : memref<64x128xf32, #tpu.memory_space<vmem>>, vector<64x128xf32>,
    return
  }
  func.func @transform_0(%arg0: i32) -> (i32, i32) {
    %c0_i32 = arith.constant 0 : i32
    %c0_i32_0 = arith.constant 0 : i32
    return %arg0, %c0_i32 : i32, i32
  }
  func.func @transform_1(%arg0: i32) -> (i32, i32) {
    %c0_i32 = arith.constant 0 : i32
    %c0_i32_0 = arith.constant 0 : i32
    %c0_i32_1 = arith.constant 0 : i32
    return %c0_i32, %c0_i32_0 : i32, i32
  }
  func.func @transform_2(%arg0: i32) -> (i32, i32) {
    %c0_i32 = arith.constant 0 : i32
    %c0_i32_0 = arith.constant 0 : i32
    %c0_i32_1 = arith.constant 0 : i32
    return %c0_i32, %c0_i32_0 : i32, i32
  }
  func.func @transform_3(%arg0: i32) -> (i32, i32) {
    %c0_i32 = arith.constant 0 : i32
    %c0_i32_0 = arith.constant 0 : i32
    %c0_i32_1 = arith.constant 0 : i32
    return %c0_i32, %c0_i32_0 : i32, i32
  }
  func.func @transform_4(%arg0: i32) -> (i32, i32) {
    %c0_i32 = arith.constant 0 : i32
    %c0_i32_0 = arith.constant 0 : i32
    %c0_i32_1 = arith.constant 0 : i32
    return %c0_i32, %c0_i32_0 : i32, i32
  }
  func.func @transform_5(%arg0: i32) -> (i32, i32) {
    %c0_i32 = arith.constant 0 : i32
    %c0_i32_0 = arith.constant 0 : i32
    return %arg0, %c0_i32 : i32, i32
  }
}

</mosaic_0001>

<bundles_post_ra>
// kernel: tpu_custom_call.1
= control target key start
LH: loop header
LB: loop body
LE: loop exit
PB: predicated region body
PF: predicated region fallthrough
CT: control target
= control target key end

     0   :  { %10 = vsyncpa [#allocation3], 0  ;;  %s865_s0 = inlined_call_operand.hbm [shape: bf16[64,128], index: 0, kind: input, shape index: {}]   ;;  %s866_s1 = inlined_call_operand.hbm [shape: bf16[128,128], index: 1, kind: input, shape index: {}]   ;;  %s867_s2 = inlined_call_operand.vmem [shape: f32[1,128], index: 2, kind: input, shape index: {}]   ;;  %s868_s3 = inlined_call_operand.hbm [shape: bf16[128,128], index: 3, kind: input, shape index: {}]   ;;  %s869_s4 = inlined_call_operand.vmem [shape: f32[1,128], index: 4, kind: input, shape index: {}]   ;;  %s870_s5 = inlined_call_operand.hbm [shape: f32[64,128], index: 5, kind: output, shape index: {}]  }
   0x1   :  { %11 = vsyncpa [#allocation6], 0 }
   0x2   :  { %12 = vsyncpa [#allocation4], 0  ;;  %s701_s18 = smov [#allocation5]   ;;  %s702_s20 = smov [#allocation2]  }
   0x3   :  { %s30_s19 = sshll.u32 %s701_s18, 4  ;;  %s18_s21 = sshll.u32 %s702_s20, 4  ;;  %s31_s19 = int_to_ptr.vmem [resolvable:$true] %s30_s19  ;;  %s739_s21 = int_to_ptr.vmem [resolvable:$true] %s18_s21 }
   0x4   :  { %s607_s24 = scalar_lea.hbm %s866_s1, 1024 }
   0x5   :  { %p608_p0 = scmp.ne.s32.totalorder %s866_s1, %s607_s24  ;;  %p611_p1 = scmp.lt.u32.totalorder %s607_s24, %s866_s1 }
   0x7   :  { %p613_p2 = pnand %p611_p1, %p608_p0 }
   0x9   :  { %616 = shalt.err (!%p613_p2)
}
   0xa   :  { %s617_s29 = scalar_lea.vmem %s31_s19, 1024  ;;  %p622_p4 = scmp.lt.s32.totalorder %s31_s19, %s31_s19 }
   0xb   :  { %p618_p3 = scmp.ne.s32.totalorder %s31_s19, %s617_s29  ;;  %p623_p5 = scmp.lt.s32.totalorder %s617_s29, %s617_s29 }
   0xd   :  { %p624_p6 = por %p623_p5, %p622_p4 }
   0xf   :  { %p625_p7 = pnand %p624_p6, %p618_p3 }
  0x11   :  { %628 = shalt.err (!%p625_p7)
}
  0x12   :  { %s703_s30 = smov 64   ;;  %s704_s6 = smov 4  }
  0x13   :  { %36 = dma.hbm_to_vmem [thread:$0]  %s866_s1, 1024, %s31_s19, [#allocation6], %s703_s30, %s703_s30, %s704_s6  }
  0x14   :  { %s629_s11 = scalar_lea.hbm %s865_s0, 512 }
  0x15   :  { %p630_p8 = scmp.ne.s32.totalorder %s865_s0, %s629_s11  ;;  %p633_p9 = scmp.lt.u32.totalorder %s629_s11, %s865_s0 }
  0x17   :  { %p635_p10 = pnand %p633_p9, %p630_p8 }
  0x19   :  { %638 = shalt.err (!%p635_p10)
}
  0x1a   :  { %s639_s16 = scalar_lea.vmem %s739_s21, 512  ;;  %p644_p12 = scmp.lt.s32.totalorder %s739_s21, %s739_s21 }
  0x1b   :  { %p640_p11 = scmp.ne.s32.totalorder %s739_s21, %s639_s16  ;;  %p645_p13 = scmp.lt.s32.totalorder %s639_s16, %s639_s16 }
  0x1d   :  { %p646_p0 = por %p645_p13, %p644_p12 }
  0x1f   :  { %p647_p1 = pnand %p646_p0, %p640_p11 }
  0x21   :  { %650 = shalt.err (!%p647_p1)
}
  0x22   :  { %24 = dma.hbm_to_vmem [thread:$0]  %s865_s0, 512, %s739_s21, [#allocation3], %s703_s30, %s703_s30, %s704_s6  }
  0x23   :  { %s705_s18 = smov [#allocation7]   ;;  %s651_s23 = scalar_lea.hbm %s868_s3, 1024 }
  0x24   :  { %s44_s19 = sshll.u32 %s705_s18, 4  ;;  %p652_p2 = scmp.ne.s32.totalorder %s868_s3, %s651_s23  ;;  %s45_s19 = int_to_ptr.vmem [resolvable:$true] %s44_s19 }
  0x25   :  { %p655_p3 = scmp.lt.u32.totalorder %s651_s23, %s868_s3 }
  0x27   :  { %p657_p4 = pnand %p655_p3, %p652_p2 }
  0x29   :  { %660 = shalt.err (!%p657_p4)
}
  0x2a   :  { %s661_s28 = scalar_lea.vmem %s45_s19, 1024  ;;  %p666_p6 = scmp.lt.s32.totalorder %s45_s19, %s45_s19 }
  0x2b   :  { %p662_p5 = scmp.ne.s32.totalorder %s45_s19, %s661_s28  ;;  %p667_p7 = scmp.lt.s32.totalorder %s661_s28, %s661_s28 }
  0x2d   :  { %p668_p8 = por %p667_p7, %p666_p6 }
  0x2f   :  { %p669_p9 = pnand %p668_p8, %p662_p5 }
  0x31   :  { %672 = shalt.err (!%p669_p9)
}
  0x32   :  { %50 = dma.hbm_to_vmem [thread:$0]  %s868_s3, 1024, %s45_s19, [#allocation6], %s703_s30, %s703_s30, %s704_s6  }
  0x33   :  { %695 = dma.done.wait [#allocation3], 512  }
  0x34   :  { %696 = vsyncadd [#allocation3], 4294966784 }
  0x35   :  { %697 = dma.done.wait [#allocation6], 2048  }
  0x36   :  { %698 = vsyncadd [#allocation6], 4294965248  ;;  %v571_v0 = vld [vmem:[#allocation5] sm:$0xff]   ;;  %v572_v1 = vld [vmem:[#allocation5 + $0x8] sm:$0xff]   ;;  %s706_s6 = smov [#allocation8]  }
  0x37   :  { %515 = vmatprep.subr.bf16.mxu0 %v571_v0  ;;  %v573_v2 = vld [vmem:[#allocation5 + $0x10] sm:$0xff]   ;;  %v574_v3 = vld [vmem:[#allocation5 + $0x18] sm:$0xff]   ;;  %v579_v4 = vld [vmem:[#allocation2] sm:$0xff]   ;;  %s456_s7 = sshll.u32 %s706_s6, 4  ;;  %s457_s7 = int_to_ptr.vmem [resolvable:$true] %s456_s7 }
  0x38   :  { %516 = vmatpush3.bf16.msra.mxu0 %v571_v0  ;;  %531 = vmatprep.mubr.bf16.mxu0 %v579_v4  ;;  %v575_v5 = vld [vmem:[#allocation5 + $0x20] sm:$0xff]   ;;  %v576_v6 = vld [vmem:[#allocation5 + $0x28] sm:$0xff]   ;;  %v577_v7 = vld [vmem:[#allocation5 + $0x30] sm:$0xff]   ;;  %p678_p11 = scmp.lt.s32.totalorder %s457_s7, %s457_s7 }
  0x39   :  { %517 = vmatprep.subr.bf16.mxu0 %v572_v1  ;;  %v578_v8 = vld [vmem:[#allocation5 + $0x38] sm:$0xff]   ;;  %v580_v9 = vld [vmem:[#allocation2 + $0x8] sm:$0xff]   ;;  %v581_v10 = vld [vmem:[#allocation2 + $0x10] sm:$0xff]  }
  0x3a   :  { %v582_v11 = vld [vmem:[#allocation2 + $0x18] sm:$0xff]   ;;  %v583_v12 = vld [vmem:[#allocation7] sm:$0xff]   ;;  %v584_v13 = vld [vmem:[#allocation7 + $0x8] sm:$0xff]  }
  0x3b   :  { %539 = vmatprep.subr.bf16.mxu1 %v583_v12  ;;  %v585_v14 = vld [vmem:[#allocation7 + $0x10] sm:$0xff]   ;;  %v586_v15 = vld [vmem:[#allocation7 + $0x18] sm:$0xff]   ;;  %v587_v16 = vld [vmem:[#allocation7 + $0x20] sm:$0xff]  }
  0x3c   :  { %518 = vmatpush3.bf16.msra.mxu0 %v572_v1  ;;  %540 = vmatpush3.bf16.msra.mxu1 %v583_v12  ;;  %v588_v17 = vld [vmem:[#allocation7 + $0x28] sm:$0xff]   ;;  %v589_v18 = vld [vmem:[#allocation7 + $0x30] sm:$0xff]   ;;  %v590_v19 = vld [vmem:[#allocation7 + $0x38] sm:$0xff]  }
  0x3d   :  { %519 = vmatprep.subr.bf16.mxu0 %v573_v2  ;;  %541 = vmatprep.subr.bf16.mxu1 %v584_v13  ;;  %v469_v20 = vld [vmem:[%s867_s2] ss:$0 sm:$0xff] }
  0x40   :  { %520 = vmatpush3.bf16.msra.mxu0 %v573_v2  ;;  %542 = vmatpush3.bf16.msra.mxu1 %v584_v13 }
  0x41   :  { %521 = vmatprep.subr.bf16.mxu0 %v574_v3  ;;  %543 = vmatprep.subr.bf16.mxu1 %v585_v14 }
  0x44   :  { %522 = vmatpush3.bf16.msra.mxu0 %v574_v3  ;;  %544 = vmatpush3.bf16.msra.mxu1 %v585_v14 }
  0x45   :  { %523 = vmatprep.subr.bf16.mxu0 %v575_v5  ;;  %545 = vmatprep.subr.bf16.mxu1 %v586_v15 }
  0x48   :  { %524 = vmatpush3.bf16.msra.mxu0 %v575_v5  ;;  %546 = vmatpush3.bf16.msra.mxu1 %v586_v15 }
  0x49   :  { %525 = vmatprep.subr.bf16.mxu0 %v576_v6  ;;  %547 = vmatprep.subr.bf16.mxu1 %v587_v16 }
  0x4c   :  { %526 = vmatpush3.bf16.msra.mxu0 %v576_v6  ;;  %548 = vmatpush3.bf16.msra.mxu1 %v587_v16 }
  0x4d   :  { %527 = vmatprep.subr.bf16.mxu0 %v577_v7  ;;  %549 = vmatprep.subr.bf16.mxu1 %v588_v17 }
  0x50   :  { %528 = vmatpush3.bf16.msra.mxu0 %v577_v7  ;;  %550 = vmatpush3.bf16.msra.mxu1 %v588_v17 }
  0x51   :  { %529 = vmatprep.subr.bf16.mxu0 %v578_v8  ;;  %551 = vmatprep.subr.bf16.mxu1 %v589_v18 }
  0x54   :  { %530 = vmatpush3.bf16.msra.mxu0 %v578_v8  ;;  %552 = vmatpush3.bf16.msra.mxu1 %v589_v18 }
  0x55   :  { %553 = vmatprep.subr.bf16.mxu1 %v590_v19 }
  0x57   :  { %532 = vmatmul.mubr.bf16.vlgmr.msra.gmra.mrb[0].mxu0 %v580_v9 }
  0x58   :  { %535 = vmatprep.mubr.bf16.mxu0 %v581_v10  ;;  %554 = vmatpush3.bf16.msra.mxu1 %v590_v19 }
  0x5f   :  { %536 = vmatmul.mubr.bf16.gmra.mrb[4].mxu0 %v582_v11 }
 0x12a   :  { %v533_v21 = vpop.f32.mrb[0].mxu0 }
 0x12b   :  { %v794_v22 = vadd.f32 %v533_v21, %v469_v20  ;;  %v200_v23 = vpop.f32.mrb[1].mxu0 }
 0x12c   :  { %v796_v24 = vadd.f32 %v469_v20, %v200_v23  ;;  %v534_v25 = vpop.f32.mrb[2].mxu0 }
 0x12d   :  { %v233_v26 = vmul.f32 %v794_v22, %v794_v22  ;;  %v800_v27 = vadd.f32 %v534_v25, %v469_v20  ;;  %v203_v28 = vpop.f32.mrb[3].mxu0 }
 0x12e   :  { %v231_v29 = vmul.f32 %v796_v24, %v796_v24  ;;  %v804_v30 = vadd.f32 %v469_v20, %v203_v28 }
 0x12f   :  { %v241_v31 = vmul.f32 %v233_v26, %v794_v22  ;;  %v234_v32 = vmul.f32 %v800_v27, %v800_v27 }
 0x130   :  { %v239_v33 = vmul.f32 %v231_v29, %v796_v24  ;;  %v232_v34 = vmul.f32 %v804_v30, %v804_v30 }
 0x131   :  { %v249_v35 = vmul.f32 0.044715, %v241_v31  ;;  %v242_v36 = vmul.f32 %v234_v32, %v800_v27 }
 0x132   :  { %v247_v37 = vmul.f32 0.044715, %v239_v33  ;;  %v240_v38 = vmul.f32 %v232_v34, %v804_v30  ;;  %v537_v39 = vpop.f32.mrb[4].mxu0 }
 0x133   :  { %v257_v40 = vadd.f32 %v249_v35, %v794_v22  ;;  %v250_v41 = vmul.f32 0.044715, %v242_v36  ;;  %v815_v42 = vadd.f32 %v537_v39, %v469_v20  ;;  %v216_v43 = vpop.f32.mrb[5].mxu0 }
 0x134   :  { %v248_v44 = vmul.f32 0.044715, %v240_v38  ;;  %v817_v45 = vadd.f32 %v469_v20, %v216_v43  ;;  %v538_v46 = vpop.f32.mrb[6].mxu0  ;;  %v255_v47 = vadd.f32 %v247_v37, %v796_v24 }
 0x135   :  { %v265_v48 = vmul.f32 0.7978846, %v257_v40  ;;  %v258_v49 = vadd.f32 %v250_v41, %v800_v27  ;;  %v237_v50 = vmul.f32 %v815_v42, %v815_v42  ;;  %v823_v51 = vadd.f32 %v538_v46, %v469_v20  ;;  %v219_v52 = vpop.f32.mrb[7].mxu0 }
 0x136   :  { %v235_v53 = vmul.f32 %v817_v45, %v817_v45  ;;  %v827_v54 = vadd.f32 %v469_v20, %v219_v52  ;;  %v256_v55 = vadd.f32 %v248_v44, %v804_v30  ;;  %v263_v56 = vmul.f32 0.7978846, %v255_v47  ;;  %v482_v52 = vld [vmem:[%s869_s4] ss:$0 sm:$0xff]  ;;  %s673_s4 = scalar_lea.vmem %s457_s7, 1024 }
 0x137   :  { %591 = vtanh.f32 %v265_v48  ;;  %v266_v57 = vmul.f32 0.7978846, %v258_v49  ;;  %v245_v58 = vmul.f32 %v237_v50, %v815_v42  ;;  %v238_v59 = vmul.f32 %v823_v51, %v823_v51  ;;  %p674_p10 = scmp.ne.s32.totalorder %s457_s7, %s673_s4  ;;  %p679_p12 = scmp.lt.s32.totalorder %s673_s4, %s673_s4 }
 0x138   :  { %v243_v60 = vmul.f32 %v235_v53, %v817_v45  ;;  %v236_v61 = vmul.f32 %v827_v54, %v827_v54  ;;  %v264_v62 = vmul.f32 0.7978846, %v256_v55  ;;  %593 = vtanh.f32 %v263_v56 }
 0x139   :  { %595 = vtanh.f32 %v266_v57  ;;  %v253_v63 = vmul.f32 0.044715, %v245_v58  ;;  %v246_v0 = vmul.f32 %v238_v59, %v823_v51  ;;  %p680_p13 = por %p679_p12, %p678_p11 }
 0x13a   :  { %v251_v1 = vmul.f32 0.044715, %v243_v60  ;;  %v244_v2 = vmul.f32 %v236_v61, %v827_v54  ;;  %597 = vtanh.f32 %v264_v62 }
 0x13b   :  { %v261_v3 = vadd.f32 %v253_v63, %v815_v42  ;;  %v254_v4 = vmul.f32 0.044715, %v246_v0  ;;  %p681_p0 = pnand %p680_p13, %p674_p10 }
 0x13c   :  { %v259_v5 = vadd.f32 %v251_v1, %v817_v45  ;;  %v252_v6 = vmul.f32 0.044715, %v244_v2 }
 0x13d   :  { %v269_v7 = vmul.f32 0.7978846, %v261_v3  ;;  %v262_v8 = vadd.f32 %v254_v4, %v823_v51 }
 0x13e   :  { %v267_v9 = vmul.f32 0.7978846, %v259_v5  ;;  %v260_v10 = vadd.f32 %v252_v6, %v827_v54 }
 0x13f   :  { %599 = vtanh.f32 %v269_v7  ;;  %v270_v11 = vmul.f32 0.7978846, %v262_v8 }
 0x140   :  { %601 = vtanh.f32 %v267_v9  ;;  %v268_v12 = vmul.f32 0.7978846, %v260_v10 }
 0x141   :  { %v592_v13 = vpop.eup %591  ;;  %603 = vtanh.f32 %v270_v11 }
 0x142   :  { %v594_v14 = vpop.eup %593  ;;  %605 = vtanh.f32 %v268_v12  ;;  %v281_v15 = vadd.f32 1.0, %v592_v13 }
 0x143   :  { %v596_v16 = vpop.eup %595  ;;  %v279_v17 = vadd.f32 1.0, %v594_v14 }
 0x144   :  { %v598_v18 = vpop.eup %597  ;;  %v282_v19 = vadd.f32 1.0, %v596_v16  ;;  %v289_v20 = vmul.f32 0.5, %v281_v15 }
 0x145   :  { %v280_v21 = vadd.f32 1.0, %v598_v18  ;;  %v287_v23 = vmul.f32 0.5, %v279_v17 }
 0x146   :  { %v290_v25 = vmul.f32 0.5, %v282_v19  ;;  %v297_v28 = vmul.f32 %v289_v20, %v794_v22 }
 0x147   :  { %v288_v26 = vmul.f32 0.5, %v280_v21  ;;  %v295_v32 = vmul.f32 %v287_v23, %v796_v24 }
 0x148   :  { %v298_v29 = vmul.f32 %v290_v25, %v800_v27 }
 0x149   :  { %v600_v31 = vpop.eup %599  ;;  %v296_v33 = vmul.f32 %v288_v26, %v804_v30 }
 0x14a   :  { %v602_v34 = vpop.eup %601  ;;  %v304_v35 = vpack.c.bf16 %v298_v29, %v297_v28  ;;  %v285_v36 = vadd.f32 1.0, %v600_v31 }
 0x14b   :  { %v604_v37 = vpop.eup %603  ;;  %v303_v38 = vpack.c.bf16 %v296_v33, %v295_v32  ;;  %v283_v39 = vadd.f32 1.0, %v602_v34 }
 0x14c   :  { %v606_v40 = vpop.eup %605  ;;  %v286_v41 = vadd.f32 1.0, %v604_v37  ;;  %v293_v43 = vmul.f32 0.5, %v285_v36 }
 0x14d   :  { %555 = vmatprep.mubr.bf16.mxu1 %v303_v38  ;;  %v284_v44 = vadd.f32 1.0, %v606_v40  ;;  %v291_v46 = vmul.f32 0.5, %v283_v39 }
 0x14e   :  { %556 = vmatmul.mubr.bf16.vlgmr.msra.gmra.mrb[0].mxu1 %v304_v35  ;;  %v294_v22 = vmul.f32 0.5, %v286_v41  ;;  %v301_v47 = vmul.f32 %v293_v43, %v815_v42 }
 0x14f   :  { %v292_v27 = vmul.f32 0.5, %v284_v44  ;;  %v299_v30 = vmul.f32 %v291_v46, %v817_v45 }
 0x150   :  { %v302_v24 = vmul.f32 %v294_v22, %v823_v51 }
 0x151   :  { %v300_v48 = vmul.f32 %v292_v27, %v827_v54 }
 0x152   :  { %v306_v49 = vpack.c.bf16 %v302_v24, %v301_v47 }
 0x153   :  { %v305_v50 = vpack.c.bf16 %v300_v48, %v299_v30 }
 0x155   :  { %559 = vmatprep.mubr.bf16.mxu1 %v305_v50 }
 0x156   :  { %560 = vmatmul.mubr.bf16.gmra.mrb[4].mxu1 %v306_v49 }
 0x221   :  { %v557_v53 = vpop.f32.mrb[0].mxu1 }
 0x222   :  { %v421_v55 = vadd.f32 %v557_v53, %v482_v52  ;;  %v412_v56 = vpop.f32.mrb[1].mxu1 }
 0x223   :  { %v413_v57 = vadd.f32 %v482_v52, %v412_v56  ;;  %v558_v58 = vpop.f32.mrb[2].mxu1 }
 0x224   :  { %445 = vst [vmem:[#allocation8 + $0x10] sm:$0xff] %v421_v55  ;;  %v424_v42 = vadd.f32 %v558_v58, %v482_v52  ;;  %v415_v51 = vpop.f32.mrb[3].mxu1 }
 0x225   :  { %443 = vst [vmem:[#allocation8] sm:$0xff] %v413_v57  ;;  %v416_v45 = vadd.f32 %v482_v52, %v415_v51 }
 0x226   :  { %446 = vst [vmem:[#allocation8 + $0x18] sm:$0xff] %v424_v42 }
 0x227   :  { %444 = vst [vmem:[#allocation8 + $0x8] sm:$0xff] %v416_v45 }
 0x229   :  { %v561_v54 = vpop.f32.mrb[4].mxu1 }
 0x22a   :  { %v437_v59 = vadd.f32 %v561_v54, %v482_v52  ;;  %v428_v60 = vpop.f32.mrb[5].mxu1 }
 0x22b   :  { %v429_v61 = vadd.f32 %v482_v52, %v428_v60  ;;  %v562_v62 = vpop.f32.mrb[6].mxu1 }
 0x22c   :  { %449 = vst [vmem:[#allocation8 + $0x30] sm:$0xff] %v437_v59  ;;  %v440_v63 = vadd.f32 %v562_v62, %v482_v52  ;;  %v431_v0 = vpop.f32.mrb[7].mxu1 }
 0x22d   :  { %447 = vst [vmem:[#allocation8 + $0x20] sm:$0xff] %v429_v61  ;;  %v432_v1 = vadd.f32 %v482_v52, %v431_v0 }
 0x22e   :  { %450 = vst [vmem:[#allocation8 + $0x38] sm:$0xff] %v440_v63 }
 0x22f   :  { %448 = vst [vmem:[#allocation8 + $0x28] sm:$0xff] %v432_v1 }
 0x230   :  { %684 = shalt.err (!%p681_p0)
}
 0x231   :  { %s685_s10 = scalar_lea.hbm %s870_s5, 1024 }
 0x232   :  { %p686_p1 = scmp.ne.s32.totalorder %s870_s5, %s685_s10  ;;  %p689_p2 = scmp.lt.u32.totalorder %s685_s10, %s870_s5 }
 0x234   :  { %p691_p3 = pnand %p689_p2, %p686_p1 }
 0x236   :  { %694 = shalt.err (!%p691_p3)
}
 0x237   :  { %s707_s15 = smov 128   ;;  %s708_s16 = smov 8  }
 0x238   :  { %462 = dma.vmem_to_hbm [thread:$0]  %s457_s7, 1024, %s870_s5, [#allocation4], %s707_s15, %s707_s15, %s708_s16  }
 0x239   :  { %699 = dma.done.wait [#allocation4], 1024  }
 0x23a   :  { %700 = vsyncadd [#allocation4], 4294966272 }
 0x23b   :  { %466 = vsyncpa [#allocation3], 1 }
 0x23c   :  { %467 = vsyncpa [#allocation6], 1 }
 0x23d   :  { %468 = vsyncpa [#allocation4], 1 }

</bundles_post_ra>
